<compile_context>
chip_gen: v7x
topology: tpu7x:2x2x1
jax: 0.10.0
libtpu: 0.0.40
codegen_flags: <defaults>
</compile_context>

<pallas_src>
import functools

import jax
import jax.numpy as jnp
from jax import lax
from jax.experimental import pallas as pl
from jax.experimental.pallas import tpu as pltpu


def _pick_tile(n, cap):
    """Largest divisor of n that is a multiple of 128 and <= cap; else n (full)."""
    best = None
    t = 128
    while t <= min(n, cap):
        if n % t == 0:
            best = t
        t += 128
    return best if best is not None else n


# ---------------------------------------------------------------------------
# Kernel 1: fused 1x1-conv projections.
#   y = W_all @ x + b_all  with  W_all = [wv; wq; wk]  (one MXU pass per tile),
#   then static row-slices write v / q / k in bf16.
# ---------------------------------------------------------------------------
def _projection_kernel(x_ref, w_ref, b_ref, q_ref, k_ref, v_ref, *, c, c4):
    x = x_ref[0]                                                 # (C, TN) f32
    y = jnp.dot(w_ref[...], x, preferred_element_type=jnp.float32)
    y = y + b_ref[...]                                           # (Ctot,1) bcast
    v_ref[0] = y[:c].astype(v_ref.dtype)                         # rows [0, C)
    q_ref[0] = y[c:c + c4].astype(q_ref.dtype)                   # rows [C, C+C4)
    k_ref[0] = y[c + c4:].astype(k_ref.dtype)                    # rows [C+C4, Ctot)


# ---------------------------------------------------------------------------
# Kernel 2: flash-style attention over the flattened spatial axis N = H*W.
#   s[k, q] = sum_c k[c, k] * q[c, q]   (bf16 MXU, f32 accumulate) -> (TK, TQ)
#   online softmax over the key (sublane) axis, running stats in VMEM scratch;
#   normalization + gamma residual applied once on the (C, TQ) accumulator.
# ---------------------------------------------------------------------------
def _attention_kernel(gamma_ref, q_ref, k_ref, v_ref, x_ref, o_ref,
                      m_sc, l_sc, acc_sc):
    j = pl.program_id(2)

    @pl.when(j == 0)
    def _():
        m_sc[...] = jnp.full_like(m_sc, -jnp.inf)
        l_sc[...] = jnp.zeros_like(l_sc)
        acc_sc[...] = jnp.zeros_like(acc_sc)

    q = q_ref[0]                                                 # (C4, TQ) bf16
    k = k_ref[0]                                                 # (C4, TK) bf16
    v = v_ref[0]                                                 # (C,  TK) bf16

    # Channel contraction folded into the MXU operand path -> (TK, TQ) f32.
    s = lax.dot_general(k, q, (((0,), (0,)), ((), ())),
                        preferred_element_type=jnp.float32)

    m_prev = m_sc[...]                                           # (1, TQ)
    m_new = jnp.maximum(m_prev, jnp.max(s, axis=0, keepdims=True))
    alpha = jnp.exp(m_prev - m_new)                              # (1, TQ)
    p = jnp.exp(s - m_new)                                       # (TK, TQ) f32

    # NOTE: l is accumulated from f32 p while the P@V numerator uses the
    # bf16-rounded p; the tiny inconsistency is intentional and covered by the
    # widened tolerance (exp stays f32 so the kernel is portable to v5e).
    l_sc[...] = alpha * l_sc[...] + jnp.sum(p, axis=0, keepdims=True)
    acc_sc[...] = alpha * acc_sc[...] + jnp.dot(
        v, p.astype(jnp.bfloat16), preferred_element_type=jnp.float32)
    m_sc[...] = m_new

    @pl.when(j == pl.num_programs(2) - 1)
    def _():
        inv_l = pl.reciprocal(l_sc[...], approx=True)            # (1, TQ)
        o_ref[0] = gamma_ref[0] * (acc_sc[...] * inv_l) + x_ref[0]


def self_attention_pallas(x_nchw, wq, bq, wk, bk, wv, bv, gamma):
    """x_nchw: (B, C, H, W) float32.  Returns (B, C, H, W) float32."""
    B, C, H, W = x_nchw.shape
    N = H * W
    C4 = wq.shape[0]
    Ctot = C + 2 * C4

    x = x_nchw.reshape(B, C, N).astype(jnp.float32)

    # Fused projection weights/biases, ordered [wv; wq; wk] so the largest
    # output slice starts at sublane 0.
    w_all = jnp.concatenate([wv, wq, wk], axis=0).astype(jnp.float32)   # (Ctot, C)
    b_all = jnp.concatenate([bv, bq, bk], axis=0).astype(jnp.float32)[:, None]

    # TODO(synk): if N is not a multiple of 128 the kernels fall back to one
    # full-N tile; very large non-128-multiple N would need padding plus -inf
    # key masking before the softmax.
    TN = _pick_tile(N, 2048)

    v, q, k = None, None, None
    q, k, v = pl.pallas_call(
        functools.partial(_projection_kernel, c=C, c4=C4),
        out_shape=(
            jax.ShapeDtypeStruct((B, C4, N), jnp.bfloat16),
            jax.ShapeDtypeStruct((B, C4, N), jnp.bfloat16),
            jax.ShapeDtypeStruct((B, C, N), jnp.bfloat16),
        ),
        grid=(B, N // TN),
        in_specs=[
            pl.BlockSpec((1, C, TN), lambda b, n: (b, 0, n)),    # x tile
            pl.BlockSpec((Ctot, C), lambda b, n: (0, 0)),        # fused weights
            pl.BlockSpec((Ctot, 1), lambda b, n: (0, 0)),        # fused biases
        ],
        out_specs=(
            pl.BlockSpec((1, C4, TN), lambda b, n: (b, 0, n)),   # q
            pl.BlockSpec((1, C4, TN), lambda b, n: (b, 0, n)),   # k
            pl.BlockSpec((1, C, TN), lambda b, n: (b, 0, n)),    # v
        ),
        compiler_params=pltpu.CompilerParams(
            dimension_semantics=("parallel", "parallel")),
    )(x, w_all, b_all)

    # Per-step live set at the caps (TQ=512, TK=2048): s/p ~4 MiB each in f32,
    # all BlockSpec tiles are KBs (C<=8) -> comfortably under every chip's VMEM.
    TQ = _pick_tile(N, 512)
    TK = _pick_tile(N, 2048)
    gamma_arr = jnp.asarray(gamma, jnp.float32).reshape(1)

    out = pl.pallas_call(
        _attention_kernel,
        out_shape=jax.ShapeDtypeStruct((B, C, N), jnp.float32),
        grid=(B, N // TQ, N // TK),
        in_specs=[
            pl.BlockSpec(memory_space=pltpu.MemorySpace.SMEM),      # gamma
            pl.BlockSpec((1, C4, TQ), lambda b, i, j: (b, 0, i)),   # q (bf16)
            pl.BlockSpec((1, C4, TK), lambda b, i, j: (b, 0, j)),   # k (bf16)
            pl.BlockSpec((1, C, TK), lambda b, i, j: (b, 0, j)),    # v (bf16)
            pl.BlockSpec((1, C, TQ), lambda b, i, j: (b, 0, i)),    # x residual
        ],
        out_specs=pl.BlockSpec((1, C, TQ), lambda b, i, j: (b, 0, i)),
        scratch_shapes=[
            pltpu.VMEM((1, TQ), jnp.float32),    # running max
            pltpu.VMEM((1, TQ), jnp.float32),    # running sum
            pltpu.VMEM((C, TQ), jnp.float32),    # output accumulator
        ],
        compiler_params=pltpu.CompilerParams(
            dimension_semantics=("parallel", "parallel", "arbitrary"),
            vmem_limit_bytes=48 * 1024 * 1024),
    )(gamma_arr, q, k, v, x)

    return out.reshape(B, C, H, W)


def self_attention_ref(x_nchw, wq, bq, wk, bk, wv, bv, gamma):
    """Pure-JAX reference mirroring the PyTorch forward."""
    B, C, H, W = x_nchw.shape
    N = H * W
    x = x_nchw.reshape(B, C, N)
    q = jnp.einsum('oc,bcn->bon', wq, x) + bq[None, :, None]     # (B, C/4, N)
    k = jnp.einsum('oc,bcn->bon', wk, x) + bk[None, :, None]
    v = jnp.einsum('oc,bcn->bon', wv, x) + bv[None, :, None]     # (B, C, N)
    att = jax.nn.softmax(jnp.einsum('bcq,bck->bqk', q, k), axis=-1)  # (B, N, N)
    out = jnp.einsum('bcn,bqn->bcq', v, att)                     # (B, C, N)
    return (gamma * out + x).reshape(B, C, H, W)


if __name__ == "__main__":
    key = jax.random.PRNGKey(0)
    B, C, H, W = 2, 8, 16, 16          # in_channels=8 -> query/key channels = 2
    C4 = C // 4

    keys = jax.random.split(key, 8)
    x = jax.random.normal(keys[0], (B, C, H, W), jnp.float32)
    wq = jax.random.normal(keys[1], (C4, C), jnp.float32) * 0.1
    bq = jax.random.normal(keys[2], (C4,), jnp.float32) * 0.1
    wk = jax.random.normal(keys[3], (C4, C), jnp.float32) * 0.1
    bk = jax.random.normal(keys[4], (C4,), jnp.float32) * 0.1
    wv = jax.random.normal(keys[5], (C, C), jnp.float32) * 0.1
    bv = jax.random.normal(keys[6], (C,), jnp.float32) * 0.1
    # PyTorch init sets gamma = 0 (output == x); use a nonzero deterministic
    # value so the attention path is actually exercised and checked.
    gamma = jnp.float32(0.5)

    y = self_attention_pallas(x, wq, bq, wk, bk, wv, bv, gamma)
    y = jax.block_until_ready(y)

    y_ref = self_attention_ref(x, wq, bq, wk, bk, wv, bv, gamma)
    assert y.shape == (B, C, H, W)
    max_err = float(jnp.max(jnp.abs(y - y_ref)))
    # Tolerance widened vs pure-f32: bf16 q/k/v + bf16 MXU matmuls + approx
    # reciprocal in the final softmax normalization (intentional).
    assert jnp.allclose(y, y_ref, atol=2e-2, rtol=2e-2), f"max err {max_err}"

    print("KERNEL_OK")
</pallas_src>

<mosaic_0001>
module attributes {stable_mosaic.version = 11 : i64} {
  func.func @_projection_kernel(%arg0: i32, %arg1: i32, %arg2: memref<1x8x256xf32, #tpu.memory_space<vmem>>, %arg3: memref<12x8xf32, #tpu.memory_space<vmem>>, %arg4: memref<12x1xf32, #tpu.memory_space<vmem>>, %arg5: memref<1x2x256xbf16, #tpu.memory_space<vmem>>, %arg6: memref<1x2x256xbf16, #tpu.memory_space<vmem>>, %arg7: memref<1x8x256xbf16, #tpu.memory_space<vmem>>) attributes {dimension_semantics = [#tpu.dimension_semantics<parallel>, #tpu.dimension_semantics<parallel>], iteration_bounds = array<i64: 2, 1>, scalar_prefetch = 0 : i64, scratch_operands = 0 : i64, tpu.core_type = #tpu.core_type<tc>, window_params = [{transform_indices = @transform_0, window_bounds = array<i64: 1, 8, 256>}, {pipeline_mode = #tpu.pipeline_mode<synchronous>, transform_indices = @transform_1, window_bounds = array<i64: 12, 8>}, {pipeline_mode = #tpu.pipeline_mode<synchronous>, transform_indices = @transform_2, window_bounds = array<i64: 12, 1>}, {transform_indices = @transform_3, window_bounds = array<i64: 1, 2, 256>}, {transform_indices = @transform_4, window_bounds = array<i64: 1, 2, 256>}, {transform_indices = @transform_5, window_bounds = array<i64: 1, 8, 256>}]} {
    %c0 = arith.constant 0 : index
    %c0_0 = arith.constant 0 : index
    %c0_1 = arith.constant 0 : index
    %0 = vector.load %arg2[%c0, %c0_0, %c0_1] : memref<1x8x256xf32, #tpu.memory_space<vmem>>, vector<1x8x256xf32>
    %1 = vector.shape_cast %0 : vector<1x8x256xf32> to vector<8x256xf32>
    %c0_2 = arith.constant 0 : index
    %c0_3 = arith.constant 0 : index
    %2 = vector.load %arg3[%c0_2, %c0_3] : memref<12x8xf32, #tpu.memory_space<vmem>>, vector<12x8xf32>
    %cst = arith.constant dense<0.000000e+00> : vector<12x256xf32>
    %3 = tpu.matmul %2, %1, %cst {dimension_numbers = #tpu.dot_dimension_numbers<[1], [0], [0], [1], [0, 0, 1, 1], [], []>} : vector<12x8xf32>, vector<8x256xf32>, vector<12x256xf32> -> vector<12x256xf32>
    %c0_4 = arith.constant 0 : index
    %c0_5 = arith.constant 0 : index
    %4 = vector.load %arg4[%c0_4, %c0_5] : memref<12x1xf32, #tpu.memory_space<vmem>>, vector<12x1xf32>
    %5 = vector.broadcast %4 : vector<12x1xf32> to vector<12x256xf32>
    %6 = arith.addf %3, %5 : vector<12x256xf32>
    %7 = vector.extract_strided_slice %6 {offsets = [0, 0], sizes = [8, 256], strides = [1, 1]} : vector<12x256xf32> to vector<8x256xf32>
    %8 = arith.truncf %7 : vector<8x256xf32> to vector<8x256xbf16>
    %c0_6 = arith.constant 0 : index
    %c0_7 = arith.constant 0 : index
    %c0_8 = arith.constant 0 : index
    %9 = vector.load %arg7[%c0_6, %c0_7, %c0_8] : memref<1x8x256xbf16, #tpu.memory_space<vmem>>, vector<1x8x256xbf16>
    %10 = vector.shape_cast %9 : vector<1x8x256xbf16> to vector<8x256xbf16>
    %11 = vector.shape_cast %8 : vector<8x256xbf16> to vector<1x8x256xbf16>
    tpu.vector_store %arg7[%c0_6, %c0_7, %c0_8], %11 {strides = array<i32>} : memref<1x8x256xbf16, #tpu.memory_space<vmem>>, vector<1x8x256xbf16>,
    %12 = vector.extract_strided_slice %6 {offsets = [8, 0], sizes = [2, 256], strides = [1, 1]} : vector<12x256xf32> to vector<2x256xf32>
    %13 = arith.truncf %12 : vector<2x256xf32> to vector<2x256xbf16>
    %c0_9 = arith.constant 0 : index
    %c0_10 = arith.constant 0 : index
    %c0_11 = arith.constant 0 : index
    %14 = vector.load %arg5[%c0_9, %c0_10, %c0_11] : memref<1x2x256xbf16, #tpu.memory_space<vmem>>, vector<1x2x256xbf16>
    %15 = vector.shape_cast %14 : vector<1x2x256xbf16> to vector<2x256xbf16>
    %16 = vector.shape_cast %13 : vector<2x256xbf16> to vector<1x2x256xbf16>
    tpu.vector_store %arg5[%c0_9, %c0_10, %c0_11], %16 {strides = array<i32>} : memref<1x2x256xbf16, #tpu.memory_space<vmem>>, vector<1x2x256xbf16>,
    %17 = vector.extract_strided_slice %6 {offsets = [10, 0], sizes = [2, 256], strides = [1, 1]} : vector<12x256xf32> to vector<2x256xf32>
    %18 = arith.truncf %17 : vector<2x256xf32> to vector<2x256xbf16>
    %c0_12 = arith.constant 0 : index
    %c0_13 = arith.constant 0 : index
    %c0_14 = arith.constant 0 : index
    %19 = vector.load %arg6[%c0_12, %c0_13, %c0_14] : memref<1x2x256xbf16, #tpu.memory_space<vmem>>, vector<1x2x256xbf16>
    %20 = vector.shape_cast %19 : vector<1x2x256xbf16> to vector<2x256xbf16>
    %21 = vector.shape_cast %18 : vector<2x256xbf16> to vector<1x2x256xbf16>
    tpu.vector_store %arg6[%c0_12, %c0_13, %c0_14], %21 {strides = array<i32>} : memref<1x2x256xbf16, #tpu.memory_space<vmem>>, vector<1x2x256xbf16>,
    return
  }
  func.func @transform_0(%arg0: i32, %arg1: i32) -> (i32, i32, i32) {
    %c0_i32 = arith.constant 0 : i32
    %c0_i32_0 = arith.constant 0 : i32
    return %arg0, %c0_i32, %arg1 : i32, i32, i32
  }
  func.func @transform_1(%arg0: i32, %arg1: i32) -> (i32, i32) {
    %c0_i32 = arith.constant 0 : i32
    %c0_i32_0 = arith.constant 0 : i32
    %c0_i32_1 = arith.constant 0 : i32
    return %c0_i32, %c0_i32_0 : i32, i32
  }
  func.func @transform_2(%arg0: i32, %arg1: i32) -> (i32, i32) {
    %c0_i32 = arith.constant 0 : i32
    %c0_i32_0 = arith.constant 0 : i32
    %c0_i32_1 = arith.constant 0 : i32
    return %c0_i32, %c0_i32_0 : i32, i32
  }
  func.func @transform_3(%arg0: i32, %arg1: i32) -> (i32, i32, i32) {
    %c0_i32 = arith.constant 0 : i32
    %c0_i32_0 = arith.constant 0 : i32
    return %arg0, %c0_i32, %arg1 : i32, i32, i32
  }
  func.func @transform_4(%arg0: i32, %arg1: i32) -> (i32, i32, i32) {
    %c0_i32 = arith.constant 0 : i32
    %c0_i32_0 = arith.constant 0 : i32
    return %arg0, %c0_i32, %arg1 : i32, i32, i32
  }
  func.func @transform_5(%arg0: i32, %arg1: i32) -> (i32, i32, i32) {
    %c0_i32 = arith.constant 0 : i32
    %c0_i32_0 = arith.constant 0 : i32
    return %arg0, %c0_i32, %arg1 : i32, i32, i32
  }
}

</mosaic_0001>

<bundles_post_ra>
// kernel: tpu_custom_call.1
= control target key start
LH: loop header
LB: loop body
LE: loop exit
PB: predicated region body
PF: predicated region fallthrough
CT: control target
= control target key end

     0   :  { %s1104_s0 = inlined_call_operand.vmem [shape: f32[2,8,256], index: 0, kind: input, shape index: {}]   ;;  %s1105_s1 = inlined_call_operand.vmem [shape: f32[12,8], index: 1, kind: input, shape index: {}]   ;;  %s1106_s2 = inlined_call_operand.vmem [shape: f32[12,1], index: 2, kind: input, shape index: {}]   ;;  %s1107_s3 = inlined_call_operand.hbm [shape: bf16[2,2,256], index: 3, kind: output, shape index: {0}]   ;;  %s1108_s4 = inlined_call_operand.hbm [shape: bf16[2,2,256], index: 4, kind: output, shape index: {1}]   ;;  %s1109_s5 = inlined_call_operand.hbm [shape: bf16[2,8,256], index: 5, kind: output, shape index: {2}]  }
   0x1   :  { %1111 = sst [smem:[#allocation9_spill]] %s1104_s0 }
   0x2   :  { %1112 = sst [smem:[#allocation10_spill]] %s1105_s1 }
   0x3   :  { %11 = vsyncpa [#allocation3], 0 }
   0x4   :  { %13 = vsyncpa [#allocation3 + $0x1], 0 }
   0x5   :  { %14 = vsyncpa [#allocation5], 0 }
   0x6   :  { %16 = vsyncpa [#allocation5 + $0x1], 0  ;;  %s899_s18 = smov 0   ;;  %s901_s19 = smov 0  }
   0x7   :  { %s903_s20 = smov 0   ;;  %s905_s21 = smov 0  }
   0x8   :  { %s907_s22 = smov 0   ;;  %s909_s23 = smov 0  }
   0x9 LB: > { %s620_s24 = sadd.s32 4294967295, %s861_s23   ;;  %s1110_s25 = sadd.s32 4294967294, %s861_s23   ;;  %s861_s23 = sphi %s909_s23, %s22_s23   ;;  %s857_s22 = sphi %s907_s22, %s1122_s22   ;;  %s853_s21 = sphi %s905_s21, %s1121_s21   ;;  %s849_s20 = sphi %s903_s20, %s1120_s20   ;;  %s845_s19 = sphi %s901_s19, %s1119_s19   ;;  %s841_s18 = sphi %s899_s18, %s1118_s18  }
   0xa   : > { %s34_s26 = sadd.s32 1, %s857_s22  ;;  %s113_s27 = sadd.s32 1, %s849_s20 }
   0xb   : > { %p36_p0 = scmp.ge.s32.totalorder %s34_s26, 2  ;;  %p123_p1 = scmp.ne.s32.totalorder %s849_s20, %s845_s19 }
   0xc   : > { %p124_p2 = scmp.eq.s32.totalorder %s620_s24, 1  ;;  %p129_p3 = scmp.ne.s32.totalorder %s845_s19, %s841_s18 }
   0xd   : > { %s1124_s26 = smov (%p36_p0, %s34_s26), 0  ;;  %p130_p5 = scmp.eq.s32.totalorder %s1110_s25, 1 }
   0xe   : > { %p941_p4 = por %p124_p2, %p123_p1  ;;  %s108_s29 = ssub.s32 %s857_s22, %s1124_s26 }
   0xf   : > { %p624_p6 = scmp.ge.s32.totalorder %s861_s23, 1  ;;  %p111_p7 = scmp.eq.s32.totalorder %s108_s29, 0 }
  0x10   : > { %p950_p8 = por %p130_p5, %p129_p3  ;;  %p223_p9 = scmp.lt.s32.totalorder %s861_s23, 3 }
  0x11   : > { %s956_s6 = scalar_select %p111_p7, %s849_s20, %s113_s27  }
  0x12   : > { %p224_p10 = pnand %p624_p6, %p223_p9 }
  0x13   : > { %p266_p11 = scmp.lt.s32.totalorder (!%p224_p10), %s853_s21, 1  ;;  %v863_v0 = vmov (!%p224_p10), 0.0   ;;  %v283_v1 = vld [vmem:[%s1106_s2 + $0x8] sm:$0xf] (!%p224_p10)  ;;  %v864_v2 = vmov (!%p224_p10), 0   ;;  %s1115_s0 = sld [smem:[#allocation9_spill]] (!%p224_p10)  ;;  %v395_v11 = vlaneseq (!%p224_p10) }
  0x14   : > { %227 = sbr.rel (%p224_p10) target bundleno = 312 (0x138), region = 32  ;;  %365 = vmatprep.mubr.f32.mxu0 (!%p224_p10), %v863_v0  ;;  %371 = vmatprep.mubr.f32.mxu1 (!%p224_p10), %v863_v0  ;;  %s1116_s1 = sld [smem:[#allocation10_spill]] (!%p224_p10)  ;;  %vm294_vm0 = vcmask (!%p224_p10), 64512   ;;  %v282_v7 = vld [vmem:[%s1106_s2] sm:$0xff] (!%p224_p10)  ;;  %v865_v9 = vmov (!%p224_p10), 1966171168  }
  0x15   : > { %722 = vset.pattern.permute.xlu0 (!%p224_p10), %v864_v2  ;;  %v393_v10 = vunpack.c.l.s4 (!%p224_p10), %v865_v9  ;;  %s976_s7 = sand.u32 (!%p224_p10), 1, %s845_s19   ;;  %v396_v14 = vshrl.u32 (!%p224_p10), %v395_v11, 7  ;;  %s649_s11 = sshll.u32 (!%p224_p10), %s853_s21, 5 }
  0x16   : > { %291 = vperm.xlu0 (!%p224_p10), %722, %v283_v1   ;;  %s627_s8 = sshll.u32 (!%p224_p10), %s976_s7, 3  ;;  %s651_s16 = sshll.u32 (!%p224_p10), %s853_s21, 7 }
  0x17   : > { %v394_v13 = vunpack.c.0.s8 (!%p224_p10), %v393_v10  ;;  %s992_s25 = scalar_lea.hbm (!%p224_p10), %s1107_s3, %s649_s11  ;;  %s419_s27 = scalar_lea.sflag (!%p224_p10), [#allocation3], %s976_s7 }
  0x19   : > { %v397_v23 = vsub.s32 (!%p224_p10), %v394_v13, %v396_v14 }
  0x1a   : > { %v280_v3 = vld [vmem:[%s1116_s1] sm:$0xff] (!%p224_p10)  ;;  %v281_v6 = vld [vmem:[%s1116_s1 + $0x8] sm:$0xf] (!%p224_p10)  ;;  %286 = vperm.xlu0 (!%p224_p10), %722, %v282_v7  }
  0x1b   : > { %s267_s9 = scalar_select %p266_p11, %s853_s21, 1 }
  0x1d   : > { %s647_s10 = sshll.u32 %s267_s9, 4  ;;  %s625_s9 = sshll.u32 %s976_s7, 1 }
  0x1e   : > { %s273_s13 = scalar_lea.vmem %s1115_s0, %s647_s10  ;;  %s982_s10 = sand.u32 1, %s620_s24  }
  0x1f   : > { %v279_v4 = vld [vmem:[%s273_s13 + $0x8] sm:$0xff]  ;;  %v278_v5 = vld [vmem:[%s273_s13] sm:$0xff]  ;;  %s250_s12 = scalar_lea.vmem [#allocation2], %s625_s9  ;;  %s985_s14 = scalar_lea.vmem [#allocation4], %s625_s9 }
  0x20   : > { %301 = vmatprep.subr.mxu0 %v279_v4  ;;  %652 = vmatprep.subr.mxu1 %v279_v4  ;;  %s445_s13 = sshll.u32 %s250_s12, 4  ;;  %s461_s15 = sshll.u32 %s985_s14, 4  ;;  %s994_s13 = int_to_ptr.vmem [resolvable:$true] %s445_s13  ;;  %s1001_s15 = int_to_ptr.vmem [resolvable:$true] %s461_s15 }
  0x21   : > { %302 = vmatpush1.msra.mxu0 %v278_v5  ;;  %653 = vmatpush1.msra.mxu1 %v278_v5  ;;  %s264_s24 = scalar_lea.vmem [#allocation6], %s627_s8  ;;  %s999_s9 = scalar_lea.hbm %s1108_s4, %s649_s11 }
  0x22   : > { %630 = vmatmul.mubr.msk.f32.vlgmr.msra.gmra.mrb[0].mxu0 %vm294_vm0, %v280_v3  ;;  %631 = vmatmul.mubr.msk.f32.vlgmr.msra.gmra.mrb[0].mxu1 %vm294_vm0, %v281_v6  ;;  %s477_s17 = sshll.u32 %s264_s24, 4  ;;  %s723_s29 = scalar_lea.vmem %s994_s13, 32  ;;  %s1008_s17 = int_to_ptr.vmem [resolvable:$true] %s477_s17 }
  0x23   : > { %p724_p12 = scmp.ne.s32.totalorder %s994_s13, %s723_s29  ;;  %s866_s0 = smov [#allocation2]  }
  0x24   : > { %s727_s1 = sshll.u32 %s866_s0, 4  ;;  %s728_s1 = int_to_ptr.vmem [resolvable:$false] %s727_s1 }
  0x25   : > { %p725_p13 = pnand %p724_p12, %p941_p4  ;;  %s729_s11 = scalar_lea.vmem %s728_s1, 64 }
  0x26   : > { %p730_p1 = scmp.lt.s32.totalorder %s994_s13, %s728_s1  ;;  %p731_p2 = scmp.lt.s32.totalorder %s729_s11, %s723_s29 }
  0x27   : > { %p726_p0 = pneg %p725_p13 }
  0x28   : > { %p732_p3 = por %p731_p2, %p730_p1 }
  0x2a   : > { %p733_p5 = pnand %p732_p3, %p726_p0 }
  0x95   : > { %v292_v8 = vpop.permute.xlu0 %291 }
  0x99   : > { %v287_v12 = vpop.permute.xlu0 %286 }
  0xf5   : > { %v367_v15 = vpop.f32.mrb[0].mxu0  ;;  %v373_v16 = vpop.f32.mrb[0].mxu1 }
  0xf6   : > { %v374_v17 = vadd.f32 %v373_v16, %v292_v8  ;;  %v368_v18 = vadd.f32 %v367_v15, %v287_v12  ;;  %v369_v19 = vpop.f32.mrb[1].mxu0  ;;  %v375_v20 = vpop.f32.mrb[1].mxu1 }
  0xf7   : > { %v370_v21 = vadd.f32 %v369_v19, %v287_v12  ;;  %v376_v22 = vadd.f32 %v375_v20, %v292_v8 }
  0xf9   : > { %v648_v24 = vpack.c.bf16 %v370_v21, %v368_v18  ;;  %v633_v25 = vpack.c.bf16 %v376_v22, %v374_v17 }
  0xfb   : > { %386 = vst [vmem:[%s264_s24] sm:$0xff] %v648_v24  ;;  %v398_v26 = vrot.slane %v633_v25, %v397_v23  ;;  %s1006_s24 = scalar_lea.hbm %s1109_s5, %s651_s16 }
  0xfd   : > { %v408_v27 = vcombine.high %v398_v26, %v398_v26  ;;  %634 = vst.sshfl [vmem:[%s250_s12] sm:$0x5 pattern:$0x73625140] %v398_v26 }
  0xfe   : > { %736 = shalt.err (!%p733_p5)
}
  0xff   : > { %s737_s7 = scalar_lea.hbm %s992_s25, 32  ;;  %s741_s21 = scalar_lea.hbm %s1107_s3, 64 }
 0x100   : > { %p738_p6 = scmp.ne.s32.totalorder %s992_s25, %s737_s7  ;;  %p742_p10 = scmp.lt.u32.totalorder %s992_s25, %s1107_s3 }
 0x101   : > { %p743_p11 = scmp.lt.u32.totalorder %s741_s21, %s737_s7  ;;  %p745_p13 = scmp.lt.u32.totalorder %s737_s7, %s992_s25 }
 0x102   : > { %p739_p7 = pnand %p738_p6, %p941_p4 }
 0x103   : > { %p744_p12 = por %p743_p11, %p742_p10 }
 0x104   : > { %p740_p9 = pneg %p739_p7 }
 0x105   : > { %p746_p0 = por %p745_p13, %p744_p12 }
 0x107   : > { %p747_p1 = pnand %p746_p0, %p740_p9 }
 0x109   : > { %750 = shalt.err (!%p747_p1)
}
 0x10a   : > { %654 = dma.vmem_to_hbm [thread:$0]  (%p941_p4), %s994_s13, 32, %s992_s25, %s419_s27   ;;  %635 = vst.sshfl [vmem:[%s985_s14] sm:$0x5 pattern:$0x73625140] %v408_v27 }
 0x10b   : > { %s424_s29 = scalar_lea.sflag [#allocation5], %s982_s10  ;;  %s751_s1 = scalar_lea.vmem %s1001_s15, 32 }
 0x10c   : > { %p752_p2 = scmp.ne.s32.totalorder %s1001_s15, %s751_s1  ;;  %s867_s11 = smov [#allocation4]  }
 0x10d   : > { %s755_s7 = sshll.u32 %s867_s11, 4  ;;  %s756_s7 = int_to_ptr.vmem [resolvable:$false] %s755_s7 }
 0x10e   : > { %p753_p3 = pnand %p752_p2, %p941_p4  ;;  %s757_s12 = scalar_lea.vmem %s756_s7, 64 }
 0x10f   : > { %p758_p6 = scmp.lt.s32.totalorder %s1001_s15, %s756_s7  ;;  %p759_p7 = scmp.lt.s32.totalorder %s757_s12, %s751_s1 }
 0x110   : > { %p754_p5 = pneg %p753_p3 }
 0x111   : > { %p760_p9 = por %p759_p7, %p758_p6 }
 0x113   : > { %p761_p10 = pnand %p760_p9, %p754_p5 }
 0x115   : > { %764 = shalt.err (!%p761_p10)
}
 0x116   : > { %s765_s25 = scalar_lea.hbm %s999_s9, 32  ;;  %s769_s27 = scalar_lea.hbm %s1108_s4, 64 }
 0x117   : > { %p766_p11 = scmp.ne.s32.totalorder %s999_s9, %s765_s25  ;;  %p770_p0 = scmp.lt.u32.totalorder %s999_s9, %s1108_s4 }
 0x118   : > { %p771_p1 = scmp.lt.u32.totalorder %s769_s27, %s765_s25  ;;  %p773_p3 = scmp.lt.u32.totalorder %s765_s25, %s999_s9 }
 0x119   : > { %p767_p12 = pnand %p766_p11, %p941_p4 }
 0x11a   : > { %p772_p2 = por %p771_p1, %p770_p0 }
 0x11b   : > { %p768_p13 = pneg %p767_p12 }
 0x11c   : > { %p774_p5 = por %p773_p3, %p772_p2 }
 0x11e   : > { %p775_p6 = pnand %p774_p5, %p768_p13 }
 0x120   : > { %778 = shalt.err (!%p775_p6)
}
 0x121   : > { %655 = dma.vmem_to_hbm [thread:$0]  (%p941_p4), %s1001_s15, 32, %s999_s9, %s424_s29  }
 0x122   : > { %s779_s8 = scalar_lea.vmem %s1008_s17, 128  ;;  %s868_s0 = smov [#allocation6]  }
 0x123   : > { %p780_p7 = scmp.ne.s32.totalorder %s1008_s17, %s779_s8  ;;  %s783_s1 = sshll.u32 %s868_s0, 4  ;;  %s784_s1 = int_to_ptr.vmem [resolvable:$false] %s783_s1 }
 0x124   : > { %s785_s11 = scalar_lea.vmem %s784_s1, 256  ;;  %p786_p11 = scmp.lt.s32.totalorder %s1008_s17, %s784_s1 }
 0x125   : > { %p781_p9 = pnand %p780_p7, %p941_p4  ;;  %p787_p12 = scmp.lt.s32.totalorder %s785_s11, %s779_s8 }
 0x127   : > { %p782_p10 = pneg %p781_p9  ;;  %p788_p13 = por %p787_p12, %p786_p11 }
 0x129   : > { %p789_p0 = pnand %p788_p13, %p782_p10 }
 0x12b   : > { %792 = shalt.err (!%p789_p0)
}
 0x12c   : > { %s793_s15 = scalar_lea.hbm %s1006_s24, 128  ;;  %s797_s12 = scalar_lea.hbm %s1109_s5, 256 }
 0x12d   : > { %p794_p1 = scmp.ne.s32.totalorder %s1006_s24, %s793_s15  ;;  %p798_p5 = scmp.lt.u32.totalorder %s1006_s24, %s1109_s5 }
 0x12e   : > { %p799_p6 = scmp.lt.u32.totalorder %s797_s12, %s793_s15  ;;  %p801_p9 = scmp.lt.u32.totalorder %s793_s15, %s1006_s24 }
 0x12f   : > { %p795_p2 = pnand %p794_p1, %p941_p4 }
 0x130   : > { %p800_p7 = por %p799_p6, %p798_p5 }
 0x131   : > { %p796_p3 = pneg %p795_p2 }
 0x132   : > { %p802_p10 = por %p801_p9, %p800_p7 }
 0x134   : > { %p803_p11 = pnand %p802_p10, %p796_p3 }
 0x136   : > { %806 = shalt.err (!%p803_p11)
}
 0x137   : > { %656 = dma.vmem_to_hbm [thread:$0]  (%p941_p4), %s1008_s17, 128, %s1006_s24, %s424_s29  }
 0x138 PF: > { %p670_p12 = scmp.ge.s32.totalorder %s861_s23, 2  ;;  %s489_s14 = sand.u32 1, %s841_s18  }
 0x139   : > { %s490_s27 = scalar_lea.sflag [#allocation3], %s489_s14 }
 0x13a   : > { %p661_p13 = pnand %p670_p12, %p950_p8 }
 0x13c   : > { %832 = dma.done.wait (!%p661_p13), %s490_s27, 32  }
 0x13d   : > { %834 = vsyncadd (!%p661_p13), %s490_s27, 4294967264  ;;  %s1117_s16 = sadd.s32 4294967294, %s861_s23  }
 0x13e   : > { %s498_s21 = sand.u32 1, %s1117_s16  }
 0x13f   : > { %s499_s28 = scalar_lea.sflag [#allocation5], %s498_s21 }
 0x140   : > { %836 = dma.done.wait (!%p661_p13), %s499_s28, 160  }
 0x141   : > { %838 = vsyncadd (!%p661_p13), %s499_s28, 4294967136  ;;  %s22_s23 = sadd.s32 1, %s861_s23   ;;  %s1118_s18 = smov %s845_s19 }
 0x142   : > { %p19_p4 = scmp.ge.s32.totalorder %s22_s23, 4   ;;  %s1119_s19 = smov %s849_s20 }
 0x143   : > { %s1120_s20 = smov %s956_s6  ;;  %s1121_s21 = smov %s857_s22 }
 0x144   : > { %s1122_s22 = smov %s1124_s26  ;;  %21 = sbr.rel (!%p19_p4) target bundleno = 9 (0x9), region = 99 }
 0x14b   :  { %513 = vsyncpa [#allocation3], 1 }
 0x14c   :  { %515 = vsyncpa [#allocation3 + $0x1], 1 }
 0x14d   :  { %516 = vsyncpa [#allocation5], 1 }
 0x14e   :  { %518 = vsyncpa [#allocation5 + $0x1], 1 }

</bundles_post_ra>
